<compile_context>
chip_gen: v7x
topology: tpu7x:2x2x1
jax: 0.10.0
libtpu: 0.0.40
codegen_flags: <defaults>
</compile_context>

<pallas_src>
import functools
import math

import jax
import jax.numpy as jnp
from jax.experimental import pallas as pl
from jax.experimental.pallas import tpu as pltpu


# ---------------------------------------------------------------------------
# Tiled projection matmul (bf16 operands, f32 accumulator)
# ---------------------------------------------------------------------------

def _matmul_kernel(x_ref, w_ref, o_ref, acc_ref):
    @pl.when(pl.program_id(2) == 0)
    def _():
        acc_ref[...] = jnp.zeros_like(acc_ref)

    acc_ref[...] += jnp.dot(x_ref[...], w_ref[...],
                            preferred_element_type=jnp.float32)

    @pl.when(pl.program_id(2) == pl.num_programs(2) - 1)
    def _():
        o_ref[...] = acc_ref[...].astype(o_ref.dtype)


def _pick_tile(dim, pref):
    """Largest of (pref, 512, 256, 128) dividing dim, else the full dim."""
    if dim <= pref:
        return dim
    for t in (pref, 512, 256, 128):
        if t <= pref and dim % t == 0:
            return t
    return dim


def matmul(x, w, out_dtype=jnp.float32, tm=512, tn=512, tk=512):
    """[M, K] @ [K, N] -> [M, N]; pipelined, megacore-parallel grid."""
    M, K = x.shape
    K2, N = w.shape
    assert K == K2
    tm, tn, tk = _pick_tile(M, tm), _pick_tile(N, tn), _pick_tile(K, tk)
    return pl.pallas_call(
        _matmul_kernel,
        grid=(M // tm, N // tn, K // tk),
        in_specs=[pl.BlockSpec((tm, tk), lambda i, j, k: (i, k)),
                  pl.BlockSpec((tk, tn), lambda i, j, k: (k, j))],
        out_specs=pl.BlockSpec((tm, tn), lambda i, j, k: (i, j)),
        out_shape=jax.ShapeDtypeStruct((M, N), out_dtype),
        scratch_shapes=[pltpu.VMEM((tm, tn), jnp.float32)],
        compiler_params=pltpu.CompilerParams(
            dimension_semantics=("parallel", "parallel", "arbitrary")),
    )(x, w)


# ---------------------------------------------------------------------------
# Strided-roll capability probe (determines the skew roll direction once)
# ---------------------------------------------------------------------------

_ROLL_STRIDE_CACHE = "unset"


def _roll_skew_stride():
    """Find the stride s so that pltpu.roll(x, 0, 1, stride=s, stride_axis=0)
    realizes out[r, c] = x[r, (c - r) mod N].  Returns +1/-1, or None when the
    strided lane roll is unavailable (then the unfused fallback path is used)."""
    global _ROLL_STRIDE_CACHE
    if _ROLL_STRIDE_CACHE != "unset":
        return _ROLL_STRIDE_CACHE
    N = 128
    x = jnp.broadcast_to(jnp.arange(N, dtype=jnp.float32), (8, N))
    want = ((jnp.arange(N)[None, :] - jnp.arange(8)[:, None]) % N
            ).astype(jnp.float32)
    result = None
    for stride in (1, -1):
        try:
            def _probe_kernel(x_ref, o_ref, _s=stride):
                o_ref[...] = pltpu.roll(x_ref[...], 0, 1,
                                        stride=_s, stride_axis=0)
            out = pl.pallas_call(
                _probe_kernel,
                out_shape=jax.ShapeDtypeStruct((8, N), jnp.float32))(x)
            out = jax.block_until_ready(out)
            if bool(jnp.array_equal(out, want)):
                result = stride
                break
        except Exception:
            continue
    _ROLL_STRIDE_CACHE = result
    return result


# ---------------------------------------------------------------------------
# Shared in-kernel helpers
# ---------------------------------------------------------------------------

def _softmax_pv(logits, v, scale):
    logits = logits * scale
    m = jnp.max(logits, axis=-1, keepdims=True)
    p = jnp.exp(logits - m)
    # EUP-approx reciprocal: ~1e-3 relative error, well under the bf16 noise
    # floor of the operands.
    p = p * pl.reciprocal(jnp.sum(p, axis=-1, keepdims=True), approx=True)
    return jnp.dot(p.astype(v.dtype), v, preferred_element_type=jnp.float32)


def _store_heads(o_ref, ctx_fn, heads, head_dim):
    """Store per-head [S, D] results into the head-merged [S, heads*D] block.

    Heads are processed with a small static loop (G is kept small by the
    VMEM-driven head grouping, which bounds live ranges), and whole 128-lane
    groups are stored at once so the stores stay unmasked when D < 128."""
    D = head_dim
    sg = 1
    if D < 128 and 128 % D == 0 and heads % (128 // D) == 0:
        sg = 128 // D
    for g0 in range(0, heads, sg):
        parts = [ctx_fn(g) for g in range(g0, g0 + sg)]
        blk = parts[0] if sg == 1 else jnp.concatenate(parts, axis=-1)
        o_ref[:, g0 * D:(g0 + sg) * D] = blk.astype(o_ref.dtype)


# ---------------------------------------------------------------------------
# Fused attention: content + positional logits + in-VMEM skew + softmax + PV
# ---------------------------------------------------------------------------

def _fused_attention_kernel(q_ref, k_ref, v_ref, kp_ref, bc_ref, bp_ref, o_ref,
                            *, scale, heads, head_dim, in_len, roll_stride):
    # q_ref: (S, G*D) bf16      k_ref/v_ref: (L, G*D) bf16
    # kp_ref: (Wpad, G*D) bf16  bc_ref/bp_ref: (1, G*D) f32   o_ref: (S, G*D)
    L, D = in_len, head_dim

    def per_head(g):
        sl = slice(g * D, (g + 1) * D)
        q = q_ref[:, sl].astype(jnp.float32)                         # [S, D]
        qc = (q + bc_ref[:, sl]).astype(jnp.bfloat16)
        qp = (q + bp_ref[:, sl]).astype(jnp.bfloat16)
        k, v, kp = k_ref[:, sl], v_ref[:, sl], kp_ref[:, sl]
        content = jax.lax.dot_general(
            qc, k, (((1,), (1,)), ((), ())),
            preferred_element_type=jnp.float32)                      # [S, L]
        pos_full = jax.lax.dot_general(
            qp, kp, (((1,), (1,)), ((), ())),
            preferred_element_type=jnp.float32)                      # [S, Wpad]
        # Relative-position skew fused in VMEM: query row s needs pos_full
        # columns [L-1-s, 2L-2-s]; the per-sublane strided lane roll moves
        # them to the static column window [L-1, 2L-2].
        rolled = pltpu.roll(pos_full, 0, 1,
                            stride=roll_stride, stride_axis=0)
        pos = rolled[:, L - 1:2 * L - 1]                             # [S, L]
        return _softmax_pv(content + pos, v, scale)

    _store_heads(o_ref, per_head, heads, D)


def fused_attention(q3, kv4, kp2, bc2, bp2, *, scale, D, G, roll_stride):
    B, S, HD = q3.shape
    H = HD // D
    L = kv4.shape[1]
    Wpad = kp2.shape[0]
    kernel = functools.partial(_fused_attention_kernel, scale=scale, heads=G,
                               head_dim=D, in_len=L, roll_stride=roll_stride)
    return pl.pallas_call(
        kernel,
        # Head-group outer / batch inner: the shared k_pos block index only
        # changes on the slow axis, so it is DMA'd H/G times, not B*H/G.
        grid=(H // G, B),
        in_specs=[
            pl.BlockSpec((None, S, G * D), lambda hg, b: (b, 0, hg)),
            pl.BlockSpec((None, L, None, G * D), lambda hg, b: (b, 0, 0, hg)),
            pl.BlockSpec((None, L, None, G * D), lambda hg, b: (b, 0, 1, hg)),
            pl.BlockSpec((Wpad, G * D), lambda hg, b: (0, hg)),
            pl.BlockSpec((1, G * D), lambda hg, b: (0, hg)),
            pl.BlockSpec((1, G * D), lambda hg, b: (0, hg)),
        ],
        out_specs=pl.BlockSpec((None, S, G * D), lambda hg, b: (b, 0, hg)),
        out_shape=jax.ShapeDtypeStruct((B, S, HD), jnp.bfloat16),
        compiler_params=pltpu.CompilerParams(
            dimension_semantics=("parallel", "parallel"),
            vmem_limit_bytes=48 * 1024 * 1024),
    )(q3, kv4, kv4, kp2, bc2, bp2)


# ---------------------------------------------------------------------------
# Fallback attention (pre-shifted positional bias) — used only when the
# strided lane roll is unavailable or out_len > in_len.
# ---------------------------------------------------------------------------

def _posbias_attention_kernel(q_ref, k_ref, v_ref, pos_ref, bc_ref, o_ref,
                              *, scale, heads, head_dim):
    D = head_dim

    def per_head(g):
        sl = slice(g * D, (g + 1) * D)
        q = q_ref[:, sl].astype(jnp.float32)
        qc = (q + bc_ref[:, sl]).astype(jnp.bfloat16)
        k, v = k_ref[:, sl], v_ref[:, sl]
        content = jax.lax.dot_general(
            qc, k, (((1,), (1,)), ((), ())),
            preferred_element_type=jnp.float32)
        return _softmax_pv(content + pos_ref[g].astype(jnp.float32), v, scale)

    _store_heads(o_ref, per_head, heads, D)


def posbias_attention(q3, kv4, pos_bias, bc2, *, scale, D, G):
    B, S, HD = q3.shape
    H = HD // D
    L = kv4.shape[1]
    kernel = functools.partial(_posbias_attention_kernel, scale=scale,
                               heads=G, head_dim=D)
    return pl.pallas_call(
        kernel,
        grid=(H // G, B),
        in_specs=[
            pl.BlockSpec((None, S, G * D), lambda hg, b: (b, 0, hg)),
            pl.BlockSpec((None, L, None, G * D), lambda hg, b: (b, 0, 0, hg)),
            pl.BlockSpec((None, L, None, G * D), lambda hg, b: (b, 0, 1, hg)),
            pl.BlockSpec((None, G, S, L), lambda hg, b: (b, hg, 0, 0)),
            pl.BlockSpec((1, G * D), lambda hg, b: (0, hg)),
        ],
        out_specs=pl.BlockSpec((None, S, G * D), lambda hg, b: (b, 0, hg)),
        out_shape=jax.ShapeDtypeStruct((B, S, HD), jnp.bfloat16),
        compiler_params=pltpu.CompilerParams(
            dimension_semantics=("parallel", "parallel"),
            vmem_limit_bytes=48 * 1024 * 1024),
    )(q3, kv4, kv4, pos_bias, bc2)


# ---------------------------------------------------------------------------
# Plain-JAX glue (positional encodings, reference-style shift, head grouping)
# ---------------------------------------------------------------------------

def sinusoidal_pos_embedding(d_model, max_len, pos_offset):
    position = jnp.arange(max_len, dtype=jnp.float32)[:, None] + pos_offset
    div_term = jnp.exp(jnp.arange(0, d_model, 2, dtype=jnp.float32)
                       * (-math.log(10000.0) / d_model))
    pe = jnp.zeros((max_len, d_model), jnp.float32)
    pe = pe.at[:, 0::2].set(jnp.sin(position * div_term))
    pe = pe.at[:, 1::2].set(jnp.cos(position * div_term))
    return pe


def _shift(posmat):
    """Exact port of RelativeAttentionBase._shift. [N, S, 2L-1] -> [N, S, L]."""
    n, s, w = posmat.shape
    p = jnp.pad(posmat, ((0, 0), (0, 1), (0, 1)))
    p = p.reshape(n, (s + 1) * (w + 1))
    p = p[:, w // 2: w // 2 + w * s]
    p = p.reshape(n, s, w)
    return p[:, :, :(w + 1) // 2]


def _pick_head_group(H, D):
    """Smallest head group whose merged width is a multiple of 128 lanes.

    Extra grid steps are ~0.35 us each (essentially free), while small groups
    keep the per-step VMEM footprint bounded — important on v7x's 64 MiB — and
    every output store stays lane-dense/unmasked."""
    for G in range(1, H + 1):
        if H % G == 0 and (G * D) % 128 == 0:
            return G
    return H


# ---------------------------------------------------------------------------
# PushdownAttention forward
# ---------------------------------------------------------------------------

def pushdown_attention_forward(params, curr_state, attend_to, pos_offset=0,
                               heads_per_step=None):
    B, L, state = attend_to.shape
    S = curr_state.shape[1]
    H = params["n_heads"]
    D = state // H
    W = 2 * L - 1
    Wpad = ((W + 127) // 128) * 128          # lane-dense positional width
    scale = 1.0 / math.sqrt(D)
    bf16 = jnp.bfloat16

    if heads_per_step is None:
        G = _pick_head_group(H, D)
    else:
        G = heads_per_step
        assert H % G == 0 and (G == H or (G * D) % 128 == 0), \
            "head group must keep the merged output block 128-lane aligned"

    # --- tiny one-time weight prep (bf16 casts; reorder K/V columns so the
    #     kernels never transpose the big activations) ---
    w_q = params["w_q"].astype(bf16)
    w_kv = params["w_kv"].reshape(state, H, 2, D).transpose(0, 2, 1, 3) \
                         .reshape(state, 2 * H * D).astype(bf16)
    w_pos = params["w_pos"].astype(bf16)
    w_merge = params["w_merge"].astype(bf16)
    bc2 = params["b_content"].reshape(1, H * D).astype(jnp.float32)
    bp2 = params["b_pos"].reshape(1, H * D).astype(jnp.float32)

    # --- projections (bf16 operands, f32 accumulation, bf16 intermediates) ---
    q3 = matmul(curr_state.reshape(B * S, state).astype(bf16), w_q,
                out_dtype=bf16).reshape(B, S, H * D)
    kv4 = matmul(attend_to.reshape(B * L, state).astype(bf16), w_kv,
                 out_dtype=bf16).reshape(B, L, 2, H * D)
    pos_enc = sinusoidal_pos_embedding(state, W, 1 - L - pos_offset)
    pos_enc = jnp.pad(pos_enc, ((0, Wpad - W), (0, 0)))
    kp2 = matmul(pos_enc.astype(bf16), w_pos, out_dtype=bf16)      # [Wpad,H*D]

    roll_stride = _roll_skew_stride()
    if roll_stride is not None and S <= L:
        # Fully fused path: pos logits, skew and softmax all inside the kernel.
        ctx = fused_attention(q3, kv4, kp2, bc2, bp2, scale=scale, D=D, G=G,
                              roll_stride=roll_stride)
    else:
        # Capability fallback: compute the positional bias with XLA (small
        # k_pos) + the reference skew, feed the pre-shifted bias to the
        # attention kernel.
        q_pos = (q3.astype(jnp.float32).reshape(B, S, H, D)
                 + params["b_pos"][None, None]).astype(bf16)
        k_pos = kp2[:W].reshape(W, H, D)
        pos_full = jnp.einsum("bshd,whd->bhsw", q_pos, k_pos,
                              preferred_element_type=jnp.float32)
        pos_bias = _shift(pos_full.reshape(B * H, S, W)).reshape(B, H, S, L)
        ctx = posbias_attention(q3, kv4, pos_bias.astype(bf16), bc2,
                                scale=scale, D=D, G=G)

    # --- head merge: ctx is already the lane-dense [B, S, H*D] slab ---
    out = matmul(ctx.reshape(B * S, H * D), w_merge, out_dtype=jnp.float32)
    return out.reshape(B, S, state)


# ---------------------------------------------------------------------------
# Pure-JAX reference (mirrors the PyTorch math); mm_dtype=bf16 reproduces the
# kernel's operand casts so the structural check can be tight.
# ---------------------------------------------------------------------------

def reference_forward(params, curr_state, attend_to, pos_offset=0,
                      mm_dtype=jnp.float32):
    f32 = jnp.float32
    B, L, state = attend_to.shape
    S = curr_state.shape[1]
    H = params["n_heads"]
    D = state // H
    scale = 1.0 / math.sqrt(D)
    c = lambda x: x.astype(mm_dtype)

    kv = jnp.einsum("bli,io->blo", c(attend_to), c(params["w_kv"]),
                    preferred_element_type=f32).astype(mm_dtype)
    kv = kv.reshape(B, L, H, 2, D)
    k_content = kv[..., 0, :]                                   # [B, L, H, D]
    v = kv[..., 1, :]

    q = jnp.einsum("bsi,io->bso", c(curr_state), c(params["w_q"]),
                   preferred_element_type=f32).astype(mm_dtype)
    q = q.reshape(B, S, H, D)

    W = 2 * L - 1
    pos_enc = sinusoidal_pos_embedding(state, W, 1 - L - pos_offset)
    k_pos = jnp.einsum("wi,io->wo", c(pos_enc), c(params["w_pos"]),
                       preferred_element_type=f32).astype(mm_dtype)
    k_pos = k_pos.reshape(W, H, D)

    q_content = (q.astype(f32) + params["b_content"][None, None]).astype(mm_dtype)
    q_pos = (q.astype(f32) + params["b_pos"][None, None]).astype(mm_dtype)

    content = jnp.einsum("bshd,blhd->bhsl", q_content, k_content,
                         preferred_element_type=f32)
    pos_full = jnp.einsum("bshd,whd->bhsw", q_pos, k_pos,
                          preferred_element_type=f32)
    pos_bias = _shift(pos_full.reshape(B * H, S, W)).reshape(B, H, S, L)

    logits = (content + pos_bias) * scale
    scores = jax.nn.softmax(logits, axis=-1)
    ctx = jnp.einsum("bhsl,blhd->bshd", scores.astype(mm_dtype), v,
                     preferred_element_type=f32)
    ctx = ctx.astype(mm_dtype).reshape(B, S, H * D)
    return jnp.einsum("bsi,io->bso", ctx, c(params["w_merge"]),
                      preferred_element_type=f32)


# ---------------------------------------------------------------------------

if __name__ == "__main__":
    B, S, STATE, H = 2, 8, 32, 4
    D = STATE // H

    key = jax.random.PRNGKey(0)
    k1, k2, k3, k4, k5, k6, k7, k8 = jax.random.split(key, 8)
    sw = 1.0 / math.sqrt(STATE)
    # Deterministic synthetic parameters (module __init__ zero-inits the global
    # biases; small nonzero values exercise the in-kernel bias-add path).
    params = dict(
        n_heads=H,
        w_q=jax.random.normal(k1, (STATE, H * D), jnp.float32) * sw,
        w_kv=jax.random.normal(k2, (STATE, 2 * H * D), jnp.float32) * sw,
        w_pos=jax.random.normal(k3, (STATE, H * D), jnp.float32) * sw,
        w_merge=jax.random.normal(k4, (H * D, STATE), jnp.float32) * sw,
        b_content=jax.random.normal(k5, (H, D), jnp.float32) * 0.1,
        b_pos=jax.random.normal(k6, (H, D), jnp.float32) * 0.1,
    )

    curr_state = jax.random.normal(k7, (B, S, STATE), jnp.float32)
    attend_to = jax.random.normal(k8, (B, S, STATE), jnp.float32)

    out = pushdown_attention_forward(params, curr_state, attend_to)
    out = jax.block_until_ready(out)
    assert out.shape == (B, S, STATE)

    # Structural check against a reference that uses the same bf16 operand
    # casts (differences: accumulation order + approx reciprocal only).
    ref_bf16 = reference_forward(params, curr_state, attend_to,
                                 mm_dtype=jnp.bfloat16)
    err_bf16 = float(jnp.max(jnp.abs(out - ref_bf16)))
    assert err_bf16 < 2e-2, f"mismatch vs bf16-matched reference: {err_bf16}"

    # Fidelity check against the pure-f32 (PyTorch-equivalent) math; the
    # slack accounts for the bf16 MXU operands/intermediates.
    ref_f32 = reference_forward(params, curr_state, attend_to,
                                mm_dtype=jnp.float32)
    err_f32 = float(jnp.max(jnp.abs(out - ref_f32)))
    assert err_f32 < 0.25, f"mismatch vs f32 reference: {err_f32}"

    print("KERNEL_OK")
</pallas_src>

<mosaic_0001>
module attributes {stable_mosaic.version = 11 : i64} {
  func.func @_matmul_kernel(%arg0: i32, %arg1: i32, %arg2: i32, %arg3: memref<16x32xbf16, #tpu.memory_space<vmem>>, %arg4: memref<32x32xbf16, #tpu.memory_space<vmem>>, %arg5: memref<16x32xbf16, #tpu.memory_space<vmem>>, %arg6: memref<16x32xf32, #tpu.memory_space<vmem>>) attributes {dimension_semantics = [#tpu.dimension_semantics<parallel>, #tpu.dimension_semantics<parallel>, #tpu.dimension_semantics<arbitrary>], iteration_bounds = array<i64: 1, 1, 1>, scalar_prefetch = 0 : i64, scratch_operands = 1 : i64, tpu.core_type = #tpu.core_type<tc>, window_params = [{transform_indices = @transform_0, window_bounds = array<i64: 16, 32>}, {transform_indices = @transform_1, window_bounds = array<i64: 32, 32>}, {transform_indices = @transform_2, window_bounds = array<i64: 16, 32>}]} {
    %c0_i32 = arith.constant 0 : i32
    %0 = arith.cmpi eq, %arg2, %c0_i32 : i32
    %1 = arith.extui %0 : i1 to i32
    %c0_i32_0 = arith.constant 0 : i32
    %2 = arith.cmpi ne, %1, %c0_i32_0 : i32
    scf.if %2 {
      %cst_10 = arith.constant 0.000000e+00 : f32
      %12 = vector.broadcast %cst_10 : f32 to vector<16x32xf32>
      %c0_11 = arith.constant 0 : index
      %c0_12 = arith.constant 0 : index
      %13 = vector.load %arg6[%c0_11, %c0_12] : memref<16x32xf32, #tpu.memory_space<vmem>>, vector<16x32xf32>
      tpu.vector_store %arg6[%c0_11, %c0_12], %12 {strides = array<i32>} : memref<16x32xf32, #tpu.memory_space<vmem>>, vector<16x32xf32>,
    } else {
    }
    %c0 = arith.constant 0 : index
    %c0_1 = arith.constant 0 : index
    %3 = vector.load %arg6[%c0, %c0_1] : memref<16x32xf32, #tpu.memory_space<vmem>>, vector<16x32xf32>
    %c0_2 = arith.constant 0 : index
    %c0_3 = arith.constant 0 : index
    %4 = vector.load %arg3[%c0_2, %c0_3] : memref<16x32xbf16, #tpu.memory_space<vmem>>, vector<16x32xbf16>
    %c0_4 = arith.constant 0 : index
    %c0_5 = arith.constant 0 : index
    %5 = vector.load %arg4[%c0_4, %c0_5] : memref<32x32xbf16, #tpu.memory_space<vmem>>, vector<32x32xbf16>
    %cst = arith.constant dense<0.000000e+00> : vector<16x32xf32>
    %6 = tpu.matmul %4, %5, %cst {dimension_numbers = #tpu.dot_dimension_numbers<[1], [0], [0], [1], [0, 0, 1, 1], [], []>} : vector<16x32xbf16>, vector<32x32xbf16>, vector<16x32xf32> -> vector<16x32xf32>
    %7 = arith.addf %3, %6 : vector<16x32xf32>
    %c0_6 = arith.constant 0 : index
    %c0_7 = arith.constant 0 : index
    %8 = vector.load %arg6[%c0_6, %c0_7] : memref<16x32xf32, #tpu.memory_space<vmem>>, vector<16x32xf32>
    tpu.vector_store %arg6[%c0_6, %c0_7], %7 {strides = array<i32>} : memref<16x32xf32, #tpu.memory_space<vmem>>, vector<16x32xf32>,
    %c0_i32_8 = arith.constant 0 : i32
    %9 = arith.cmpi eq, %arg2, %c0_i32_8 : i32
    %10 = arith.extui %9 : i1 to i32
    %c0_i32_9 = arith.constant 0 : i32
    %11 = arith.cmpi ne, %10, %c0_i32_9 : i32
    scf.if %11 {
      %c0_10 = arith.constant 0 : index
      %c0_11 = arith.constant 0 : index
      %12 = vector.load %arg6[%c0_10, %c0_11] : memref<16x32xf32, #tpu.memory_space<vmem>>, vector<16x32xf32>
      %13 = arith.truncf %12 : vector<16x32xf32> to vector<16x32xbf16>
      %c0_12 = arith.constant 0 : index
      %c0_13 = arith.constant 0 : index
      %14 = vector.load %arg5[%c0_12, %c0_13] : memref<16x32xbf16, #tpu.memory_space<vmem>>, vector<16x32xbf16>
      tpu.vector_store %arg5[%c0_12, %c0_13], %13 {strides = array<i32>} : memref<16x32xbf16, #tpu.memory_space<vmem>>, vector<16x32xbf16>,
    } else {
    }
    return
  }
  func.func @transform_0(%arg0: i32, %arg1: i32, %arg2: i32) -> (i32, i32) {
    %c0_i32 = arith.constant 0 : i32
    return %arg0, %arg2 : i32, i32
  }
  func.func @transform_1(%arg0: i32, %arg1: i32, %arg2: i32) -> (i32, i32) {
    %c0_i32 = arith.constant 0 : i32
    return %arg2, %arg1 : i32, i32
  }
  func.func @transform_2(%arg0: i32, %arg1: i32, %arg2: i32) -> (i32, i32) {
    %c0_i32 = arith.constant 0 : i32
    return %arg0, %arg1 : i32, i32
  }
}

</mosaic_0001>

<bundles_post_ra>
// kernel: tpu_custom_call.1
= control target key start
LH: loop header
LB: loop body
LE: loop exit
PB: predicated region body
PF: predicated region fallthrough
CT: control target
= control target key end

     0   :  { %7 = vsyncpa [#allocation4], 0  ;;  %s329_s0 = inlined_call_operand.hbm [shape: bf16[16,32], index: 0, kind: input, shape index: {}]   ;;  %s330_s1 = inlined_call_operand.hbm [shape: bf16[32,32], index: 1, kind: input, shape index: {}]   ;;  %s331_s2 = inlined_call_operand.hbm [shape: bf16[16,32], index: 2, kind: output, shape index: {}]  }
   0x1   :  { %8 = vsyncpa [#allocation7], 0 }
   0x2   :  { %9 = vsyncpa [#allocation5], 0  ;;  %s257_s9 = smov [#allocation3]   ;;  %s185_s13 = scalar_lea.hbm %s329_s0, 128 }
   0x3   :  { %s15_s10 = sshll.u32 %s257_s9, 4  ;;  %p186_p0 = scmp.ne.s32.totalorder %s329_s0, %s185_s13  ;;  %s16_s10 = int_to_ptr.vmem [resolvable:$true] %s15_s10 }
   0x4   :  { %p189_p1 = scmp.lt.u32.totalorder %s185_s13, %s329_s0 }
   0x6   :  { %p191_p2 = pnand %p189_p1, %p186_p0 }
   0x8   :  { %194 = shalt.err (!%p191_p2)
}
   0x9   :  { %s195_s18 = scalar_lea.vmem %s16_s10, 128  ;;  %p200_p4 = scmp.lt.s32.totalorder %s16_s10, %s16_s10 }
   0xa   :  { %p196_p3 = scmp.ne.s32.totalorder %s16_s10, %s195_s18  ;;  %p201_p5 = scmp.lt.s32.totalorder %s195_s18, %s195_s18 }
   0xc   :  { %p202_p6 = por %p201_p5, %p200_p4 }
   0xe   :  { %p203_p7 = pnand %p202_p6, %p196_p3 }
  0x10   :  { %206 = shalt.err (!%p203_p7)
}
  0x11   :  { %s258_s19 = smov 64   ;;  %s259_s20 = smov 4  }
  0x12   :  { %21 = dma.hbm_to_vmem [thread:$0]  %s329_s0, 128, %s16_s10, [#allocation4], %s258_s19, %s258_s19, %s259_s20  }
  0x13   :  { %s260_s23 = smov [#allocation6]   ;;  %s207_s27 = scalar_lea.hbm %s330_s1, 256 }
  0x14   :  { %s27_s24 = sshll.u32 %s260_s23, 4  ;;  %p208_p8 = scmp.ne.s32.totalorder %s330_s1, %s207_s27  ;;  %s28_s24 = int_to_ptr.vmem [resolvable:$true] %s27_s24 }
  0x15   :  { %p211_p9 = scmp.lt.u32.totalorder %s207_s27, %s330_s1 }
  0x17   :  { %p213_p10 = pnand %p211_p9, %p208_p8 }
  0x19   :  { %216 = shalt.err (!%p213_p10)
}
  0x1a   :  { %s217_s4 = scalar_lea.vmem %s28_s24, 256  ;;  %p222_p12 = scmp.lt.s32.totalorder %s28_s24, %s28_s24 }
  0x1b   :  { %p218_p11 = scmp.ne.s32.totalorder %s28_s24, %s217_s4  ;;  %p223_p13 = scmp.lt.s32.totalorder %s217_s4, %s217_s4 }
  0x1d   :  { %p224_p0 = por %p223_p13, %p222_p12 }
  0x1f   :  { %p225_p1 = pnand %p224_p0, %p218_p11 }
  0x21   :  { %228 = shalt.err (!%p225_p1)
}
  0x22   :  { %33 = dma.hbm_to_vmem [thread:$0]  %s330_s1, 256, %s28_s24, [#allocation7], %s258_s19, %s258_s19, %s259_s20  }
  0x23   :  { %251 = dma.done.wait [#allocation4], 128  }
  0x24   :  { %252 = vsyncadd [#allocation4], 4294967168 }
  0x25   :  { %253 = dma.done.wait [#allocation7], 256  }
  0x26   :  { %254 = vsyncadd [#allocation7], 4294967040  ;;  %vm45_vm0 = vcmask 261120   ;;  %v261_v0 = vmov 0.0   ;;  %vm262_vm1 = vmmov 0   ;;  %v182_v1 = vld [vmem:[#allocation6] sm:$0xff]  }
  0x27   :  { %167 = vmatprep.subr.bf16.mxu0 %v261_v0  ;;  %171 = vmatprep.mubr.msk.bf16.mxu0 %vm262_vm1, %v261_v0  ;;  %46 = vst.msk [vmem:[#allocation2] sm:$0xff] %vm45_vm0, %v261_v0  ;;  %47 = vst.msk [vmem:[#allocation2 + $0x8] sm:$0xff] %vm45_vm0, %v261_v0  ;;  %v183_v2 = vld [vmem:[#allocation6 + $0x8] sm:$0xff]   ;;  %v184_v3 = vld [vmem:[#allocation3] sm:$0xff]   ;;  %vm135_vm2 = vcmask 257024   ;;  %s263_s1 = smov [#allocation8]  }
  0x28   :  { %168 = vmatpush3.bf16.msra.mxu0 %v182_v1  ;;  %s143_s6 = sshll.u32 %s263_s1, 4  ;;  %s144_s6 = int_to_ptr.vmem [resolvable:$true] %s143_s6 }
  0x29   :  { %169 = vmatprep.subr.bf16.mxu0 %v261_v0  ;;  %s229_s7 = scalar_lea.vmem %s144_s6, 128  ;;  %p234_p3 = scmp.lt.s32.totalorder %s144_s6, %s144_s6 }
  0x2a   :  { %p230_p2 = scmp.ne.s32.totalorder %s144_s6, %s229_s7  ;;  %p235_p4 = scmp.lt.s32.totalorder %s229_s7, %s229_s7 }
  0x2c   :  { %170 = vmatpush3.bf16.msra.mxu0 %v183_v2  ;;  %p236_p5 = por %p235_p4, %p234_p3 }
  0x2e   :  { %v48_v4 = vld [vmem:[#allocation2] sm:$0xff]  ;;  %v49_v6 = vld [vmem:[#allocation2 + $0x8] sm:$0xff]  ;;  %p237_p6 = pnand %p236_p5, %p230_p2 }
  0x2f   :  { %172 = vmatmul.mubr.msk.bf16.vlgmr.msra.gmra.mrb[0].mxu0 %vm45_vm0, %v184_v3 }
 0x102   :  { %v111_v5 = vpop.f32.mrb[0].mxu0 }
 0x103   :  { %v118_v7 = vadd.f32 %v111_v5, %v48_v4  ;;  %v173_v8 = vpop.f32.mrb[1].mxu0 }
 0x104   :  { %v114_v9 = vpop.f32.mrb[2].mxu0 }
 0x105   :  { %120 = vst.msk [vmem:[#allocation2] sm:$0xff] %vm45_vm0, %v118_v7  ;;  %v119_v10 = vadd.f32 %v114_v9, %v49_v6  ;;  %v174_v11 = vpop.f32.mrb[3].mxu0 }
 0x107   :  { %121 = vst.msk [vmem:[#allocation2 + $0x8] sm:$0xff] %vm45_vm0, %v119_v10 }
 0x10c   :  { %v125_v12 = vld [vmem:[#allocation2] sm:$0xff] }
 0x10d   :  { %v162_v13 = vpack.c.bf16 %v125_v12, %v125_v12 }
 0x10e   :  { %v126_v14 = vld [vmem:[#allocation2 + $0x8] sm:$0xff] }
 0x10f   :  { %v163_v15 = vpack.c.bf16 %v126_v14, %v126_v14  ;;  %136 = vst.msk [vmem:[#allocation8] sm:$0xf] %vm135_vm2, %v162_v13 }
 0x111   :  { %137 = vst.msk [vmem:[#allocation8 + $0x4] sm:$0xf] %vm135_vm2, %v163_v15 }
 0x112   :  { %240 = shalt.err (!%p237_p6)
}
 0x113   :  { %s241_s10 = scalar_lea.hbm %s331_s2, 128 }
 0x114   :  { %p242_p7 = scmp.ne.s32.totalorder %s331_s2, %s241_s10  ;;  %p245_p8 = scmp.lt.u32.totalorder %s241_s10, %s331_s2 }
 0x116   :  { %p247_p9 = pnand %p245_p8, %p242_p7 }
 0x118   :  { %250 = shalt.err (!%p247_p9)
}
 0x119   :  { %149 = dma.vmem_to_hbm [thread:$0]  %s144_s6, 128, %s331_s2, [#allocation5], %s258_s19, %s258_s19, %s259_s20  }
 0x11a   :  { %255 = dma.done.wait [#allocation5], 128  }
 0x11b   :  { %256 = vsyncadd [#allocation5], 4294967168 }
 0x11c   :  { %153 = vsyncpa [#allocation4], 1 }
 0x11d   :  { %154 = vsyncpa [#allocation7], 1 }
 0x11e   :  { %155 = vsyncpa [#allocation5], 1 }

</bundles_post_ra>
